<compile_context>
chip_gen: v6e
topology: v6e:2x2x1
jax: 0.10.0
libtpu: 0.0.40
codegen_flags: <defaults>
</compile_context>

<pallas_src>
import jax
import jax.numpy as jnp
from jax.experimental import pallas as pl
from jax.experimental.pallas import tpu as pltpu

_LANE = 128     # vreg lane width    (last dim alignment)
_SUBLANE = 8    # vreg sublane width (second-to-last dim alignment)


def _round_up(n, m):
    return ((n + m - 1) // m) * m


def _pad2d(a, rows, cols, dtype):
    """Cast to dtype and zero-pad a 2-D array up to (rows, cols)."""
    a = a.astype(dtype)
    pr, pc = rows - a.shape[0], cols - a.shape[1]
    if pr or pc:
        a = jnp.pad(a, ((0, pr), (0, pc)))
    return a


def _mlp_kernel(x_ref, w1_ref, b1_ref, w2_ref, b2_ref, o_ref, h_ref):
    # fc1: [TM, In] @ [In, H] on the bf16 MXU path, f32 accumulate, add bias.
    h = jnp.dot(x_ref[...], w1_ref[...], preferred_element_type=jnp.float32)
    h = h + b1_ref[...]
    # Stage hidden activation in VMEM as bf16 (operand dtype of second dot).
    h_ref[...] = h.astype(h_ref.dtype)
    # fc2: [TM, H] @ [H, Out], f32 accumulate, add bias.
    out = jnp.dot(h_ref[...], w2_ref[...], preferred_element_type=jnp.float32)
    out = out + b2_ref[...]
    o_ref[...] = out.astype(o_ref.dtype)


def prepare_params(w1, b1, w2, b2, compute_dtype=jnp.bfloat16):
    """One-time parameter prep (do NOT call per forward):
    transpose PyTorch [out, in] weights to [in, out], zero-pad every dim to a
    multiple of 128, and cast matmul operands to the MXU compute dtype.
    Biases stay f32 (added after the f32 accumulation)."""
    H, In = w1.shape
    Out, H2 = w2.shape
    assert H2 == H
    In_p = _round_up(In, _LANE)
    H_p = _round_up(H, _LANE)
    Out_p = _round_up(Out, _LANE)

    w1_t = _pad2d(w1.T, In_p, H_p, compute_dtype)
    w2_t = _pad2d(w2.T, H_p, Out_p, compute_dtype)
    b1_p = _pad2d(b1.reshape(1, -1), 1, H_p, jnp.float32)
    b2_p = _pad2d(b2.reshape(1, -1), 1, Out_p, jnp.float32)
    return (w1_t, b1_p, w2_t, b2_p, (In, H, Out))


def two_layer_mlp(x, prepared, *, tm_max=512):
    """Forward pass of TwoLayerMLP: x -> fc1 -> fc2.

    Args:
      x:        [B, In] float32 activations.
      prepared: output of prepare_params (pre-transposed / padded / cast).
    Returns:
      [B, Out] float32.
    """
    w1_t, b1_p, w2_t, b2_p, (In, H, Out) = prepared
    In_p, H_p = w1_t.shape
    Out_p = w2_t.shape[1]
    compute_dtype = w1_t.dtype
    B = x.shape[0]

    # Batch tile: sublane-aligned, capped so x/out/h tiles stay small in VMEM.
    TM = min(tm_max, _round_up(B, _SUBLANE))
    B_p = _round_up(B, TM)
    grid = (B_p // TM,)

    # Pad + cast activations once per call (lane-dense, zero-padded).
    x_p = _pad2d(x, B_p, In_p, compute_dtype)

    out_p = pl.pallas_call(
        _mlp_kernel,
        out_shape=jax.ShapeDtypeStruct((B_p, Out_p), jnp.float32),
        grid_spec=pltpu.PrefetchScalarGridSpec(
            num_scalar_prefetch=0,
            grid=grid,
            in_specs=[
                pl.BlockSpec((TM, In_p), lambda i: (i, 0)),    # x: batch-tiled
                pl.BlockSpec((In_p, H_p), lambda i: (0, 0)),   # w1: resident
                pl.BlockSpec((1, H_p), lambda i: (0, 0)),      # b1: resident
                pl.BlockSpec((H_p, Out_p), lambda i: (0, 0)),  # w2: resident
                pl.BlockSpec((1, Out_p), lambda i: (0, 0)),    # b2: resident
            ],
            out_specs=pl.BlockSpec((TM, Out_p), lambda i: (i, 0)),
            scratch_shapes=[pltpu.VMEM((TM, H_p), compute_dtype)],
        ),
        compiler_params=pltpu.CompilerParams(
            dimension_semantics=("parallel",),
            vmem_limit_bytes=48 * 1024 * 1024,
        ),
    )(x_p, w1_t, b1_p, w2_t, b2_p)

    return out_p[:B, :Out]


def init_params(key, input_size, hidden_size, output_size):
    """Deterministic PyTorch-style nn.Linear init: U(-1/sqrt(fan_in), +1/sqrt(fan_in))."""
    k1, k2, k3, k4 = jax.random.split(key, 4)
    bound1 = 1.0 / (input_size ** 0.5)
    bound2 = 1.0 / (hidden_size ** 0.5)
    w1 = jax.random.uniform(k1, (hidden_size, input_size), jnp.float32,
                            minval=-bound1, maxval=bound1)
    b1 = jax.random.uniform(k2, (hidden_size,), jnp.float32,
                            minval=-bound1, maxval=bound1)
    w2 = jax.random.uniform(k3, (output_size, hidden_size), jnp.float32,
                            minval=-bound2, maxval=bound2)
    b2 = jax.random.uniform(k4, (output_size,), jnp.float32,
                            minval=-bound2, maxval=bound2)
    return w1, b1, w2, b2


if __name__ == "__main__":
    key = jax.random.PRNGKey(0)
    kx, kp = jax.random.split(key)

    batch = 8
    input_size = 32
    hidden_size = 64
    output_size = 16

    x = jax.random.normal(kx, (batch, input_size), jnp.float32)
    w1, b1, w2, b2 = init_params(kp, input_size, hidden_size, output_size)

    prepared = prepare_params(w1, b1, w2, b2)
    out = jax.block_until_ready(two_layer_mlp(x, prepared))
    assert out.shape == (batch, output_size)
    assert out.dtype == jnp.float32

    # Tight reference: same math as the PyTorch forward, reproducing the bf16
    # operand casts the kernel uses (f32 accumulation).
    f32 = jnp.float32
    bf = lambda a: a.astype(jnp.bfloat16).astype(f32)
    hi = jax.lax.Precision.HIGHEST
    h_ref = jnp.dot(bf(x), bf(w1).T, precision=hi) + b1
    ref = jnp.dot(bf(h_ref), bf(w2).T, precision=hi) + b2
    assert jnp.allclose(out, ref, atol=2e-3, rtol=2e-3), \
        float(jnp.max(jnp.abs(out - ref)))

    # Loose sanity check against pure-f32 PyTorch math (bf16 operand error).
    ref_f32 = (x @ w1.T + b1) @ w2.T + b2
    assert jnp.allclose(out, ref_f32, atol=5e-2, rtol=5e-2)

    print("KERNEL_OK")
</pallas_src>

<mosaic_0001>
module attributes {stable_mosaic.version = 11 : i64} {
  func.func @_mlp_kernel(%arg0: i32, %arg1: memref<8x128xbf16, #tpu.memory_space<vmem>>, %arg2: memref<128x128xbf16, #tpu.memory_space<vmem>>, %arg3: memref<1x128xf32, #tpu.memory_space<vmem>>, %arg4: memref<128x128xbf16, #tpu.memory_space<vmem>>, %arg5: memref<1x128xf32, #tpu.memory_space<vmem>>, %arg6: memref<8x128xf32, #tpu.memory_space<vmem>>, %arg7: memref<8x128xbf16, #tpu.memory_space<vmem>>) attributes {dimension_semantics = [#tpu.dimension_semantics<parallel>], iteration_bounds = array<i64: 1>, scalar_prefetch = 0 : i64, scratch_operands = 1 : i64, tpu.core_type = #tpu.core_type<tc>, window_params = [{transform_indices = @transform_0, window_bounds = array<i64: 8, 128>}, {pipeline_mode = #tpu.pipeline_mode<synchronous>, transform_indices = @transform_1, window_bounds = array<i64: 128, 128>}, {pipeline_mode = #tpu.pipeline_mode<synchronous>, transform_indices = @transform_2, window_bounds = array<i64: 1, 128>}, {pipeline_mode = #tpu.pipeline_mode<synchronous>, transform_indices = @transform_3, window_bounds = array<i64: 128, 128>}, {pipeline_mode = #tpu.pipeline_mode<synchronous>, transform_indices = @transform_4, window_bounds = array<i64: 1, 128>}, {transform_indices = @transform_5, window_bounds = array<i64: 8, 128>}]} {
    %c0 = arith.constant 0 : index
    %c0_0 = arith.constant 0 : index
    %0 = vector.load %arg1[%c0, %c0_0] : memref<8x128xbf16, #tpu.memory_space<vmem>>, vector<8x128xbf16>
    %c0_1 = arith.constant 0 : index
    %c0_2 = arith.constant 0 : index
    %1 = vector.load %arg2[%c0_1, %c0_2] : memref<128x128xbf16, #tpu.memory_space<vmem>>, vector<128x128xbf16>
    %cst = arith.constant dense<0.000000e+00> : vector<8x128xf32>
    %2 = tpu.matmul %0, %1, %cst {dimension_numbers = #tpu.dot_dimension_numbers<[1], [0], [0], [1], [0, 0, 1, 1], [], []>} : vector<8x128xbf16>, vector<128x128xbf16>, vector<8x128xf32> -> vector<8x128xf32>
    %c0_3 = arith.constant 0 : index
    %c0_4 = arith.constant 0 : index
    %3 = vector.load %arg3[%c0_3, %c0_4] : memref<1x128xf32, #tpu.memory_space<vmem>>, vector<1x128xf32>
    %4 = vector.broadcast %3 : vector<1x128xf32> to vector<8x128xf32>
    %5 = arith.addf %2, %4 : vector<8x128xf32>
    %6 = arith.truncf %5 : vector<8x128xf32> to vector<8x128xbf16>
    %c0_5 = arith.constant 0 : index
    %c0_6 = arith.constant 0 : index
    %7 = vector.load %arg7[%c0_5, %c0_6] : memref<8x128xbf16, #tpu.memory_space<vmem>>, vector<8x128xbf16>
    tpu.vector_store %arg7[%c0_5, %c0_6], %6 {strides = array<i32>} : memref<8x128xbf16, #tpu.memory_space<vmem>>, vector<8x128xbf16>,
    %c0_7 = arith.constant 0 : index
    %c0_8 = arith.constant 0 : index
    %8 = vector.load %arg7[%c0_7, %c0_8] : memref<8x128xbf16, #tpu.memory_space<vmem>>, vector<8x128xbf16>
    %c0_9 = arith.constant 0 : index
    %c0_10 = arith.constant 0 : index
    %9 = vector.load %arg4[%c0_9, %c0_10] : memref<128x128xbf16, #tpu.memory_space<vmem>>, vector<128x128xbf16>
    %cst_11 = arith.constant dense<0.000000e+00> : vector<8x128xf32>
    %10 = tpu.matmul %8, %9, %cst_11 {dimension_numbers = #tpu.dot_dimension_numbers<[1], [0], [0], [1], [0, 0, 1, 1], [], []>} : vector<8x128xbf16>, vector<128x128xbf16>, vector<8x128xf32> -> vector<8x128xf32>
    %c0_12 = arith.constant 0 : index
    %c0_13 = arith.constant 0 : index
    %11 = vector.load %arg5[%c0_12, %c0_13] : memref<1x128xf32, #tpu.memory_space<vmem>>, vector<1x128xf32>
    %12 = vector.broadcast %11 : vector<1x128xf32> to vector<8x128xf32>
    %13 = arith.addf %10, %12 : vector<8x128xf32>
    %c0_14 = arith.constant 0 : index
    %c0_15 = arith.constant 0 : index
    %14 = vector.load %arg6[%c0_14, %c0_15] : memref<8x128xf32, #tpu.memory_space<vmem>>, vector<8x128xf32>
    tpu.vector_store %arg6[%c0_14, %c0_15], %13 {strides = array<i32>} : memref<8x128xf32, #tpu.memory_space<vmem>>, vector<8x128xf32>,
    return
  }
  func.func @transform_0(%arg0: i32) -> (i32, i32) {
    %c0_i32 = arith.constant 0 : i32
    %c0_i32_0 = arith.constant 0 : i32
    return %arg0, %c0_i32 : i32, i32
  }
  func.func @transform_1(%arg0: i32) -> (i32, i32) {
    %c0_i32 = arith.constant 0 : i32
    %c0_i32_0 = arith.constant 0 : i32
    %c0_i32_1 = arith.constant 0 : i32
    return %c0_i32, %c0_i32_0 : i32, i32
  }
  func.func @transform_2(%arg0: i32) -> (i32, i32) {
    %c0_i32 = arith.constant 0 : i32
    %c0_i32_0 = arith.constant 0 : i32
    %c0_i32_1 = arith.constant 0 : i32
    return %c0_i32, %c0_i32_0 : i32, i32
  }
  func.func @transform_3(%arg0: i32) -> (i32, i32) {
    %c0_i32 = arith.constant 0 : i32
    %c0_i32_0 = arith.constant 0 : i32
    %c0_i32_1 = arith.constant 0 : i32
    return %c0_i32, %c0_i32_0 : i32, i32
  }
  func.func @transform_4(%arg0: i32) -> (i32, i32) {
    %c0_i32 = arith.constant 0 : i32
    %c0_i32_0 = arith.constant 0 : i32
    %c0_i32_1 = arith.constant 0 : i32
    return %c0_i32, %c0_i32_0 : i32, i32
  }
  func.func @transform_5(%arg0: i32) -> (i32, i32) {
    %c0_i32 = arith.constant 0 : i32
    %c0_i32_0 = arith.constant 0 : i32
    return %arg0, %c0_i32 : i32, i32
  }
}

</mosaic_0001>

<bundles_post_ra>
// kernel: tpu_custom_call.1
= control target key start
LH: loop header
LB: loop body
LE: loop exit
PB: predicated region body
PF: predicated region fallthrough
CT: control target
= control target key end

     0   :  { %10 = vsyncpa [#allocation4], 0  ;;  %s546_s0 = inlined_call_operand.hbm [shape: bf16[8,128], index: 0, kind: input, shape index: {}]   ;;  %s547_s1 = inlined_call_operand.hbm [shape: bf16[128,128], index: 1, kind: input, shape index: {}]   ;;  %s548_s2 = inlined_call_operand.vmem [shape: f32[1,128], index: 2, kind: input, shape index: {}]   ;;  %s549_s3 = inlined_call_operand.hbm [shape: bf16[128,128], index: 3, kind: input, shape index: {}]   ;;  %s550_s4 = inlined_call_operand.vmem [shape: f32[1,128], index: 4, kind: input, shape index: {}]   ;;  %s551_s5 = inlined_call_operand.hbm [shape: f32[8,128], index: 5, kind: output, shape index: {}]  }
   0x1   :  { %11 = vsyncpa [#allocation7], 0 }
   0x2   :  { %12 = vsyncpa [#allocation5], 0  ;;  %s490_s18 = smov [#allocation6]  }
   0x3   :  { %s28_s19 = sshll.u32 %s490_s18, 4  ;;  %s29_s19 = int_to_ptr.vmem [resolvable:$true] %s28_s19 }
   0x4   :  { %s412_s20 = scalar_lea.vmem %s29_s19, 1024  ;;  %p417_p1 = scmp.lt.s32.totalorder %s29_s19, %s29_s19 }
   0x5   :  { %p413_p0 = scmp.ne.s32.totalorder %s29_s19, %s412_s20  ;;  %p418_p2 = scmp.lt.s32.totalorder %s412_s20, %s412_s20 }
   0x7   :  { %p419_p3 = por %p418_p2, %p417_p1 }
   0x9   :  { %p420_p4 = pnand %p419_p3, %p413_p0 }
   0xb   :  { %423 = shalt.err (!%p420_p4)
}
   0xc   :  { %s491_s21 = smov 64   ;;  %s492_s22 = smov 4  }
   0xd   :  { %34 = dma.hbm_to_vmem [thread:$0]  %s547_s1, 1024, %s29_s19, [#allocation7], %s491_s21, %s491_s21, %s492_s22  }
   0xe   :  { %s493_s25 = smov [#allocation3]   ;;  %s494_s27 = smov [#allocation8]  }
   0xf   :  { %s19_s26 = sshll.u32 %s493_s25, 4  ;;  %s42_s28 = sshll.u32 %s494_s27, 4  ;;  %s20_s26 = int_to_ptr.vmem [resolvable:$true] %s19_s26  ;;  %s43_s28 = int_to_ptr.vmem [resolvable:$true] %s42_s28 }
  0x10   :  { %s432_s29 = scalar_lea.vmem %s20_s26, 64  ;;  %p437_p6 = scmp.lt.s32.totalorder %s20_s26, %s20_s26 }
  0x11   :  { %p433_p5 = scmp.ne.s32.totalorder %s20_s26, %s432_s29  ;;  %p438_p7 = scmp.lt.s32.totalorder %s432_s29, %s432_s29 }
  0x13   :  { %p439_p8 = por %p438_p7, %p437_p6 }
  0x15   :  { %p440_p9 = pnand %p439_p8, %p433_p5 }
  0x17   :  { %443 = shalt.err (!%p440_p9)
}
  0x18   :  { %22 = dma.hbm_to_vmem [thread:$0]  %s546_s0, 64, %s20_s26, [#allocation4]  }
  0x19   :  { %s452_s7 = scalar_lea.vmem %s43_s28, 1024  ;;  %p457_p11 = scmp.lt.s32.totalorder %s43_s28, %s43_s28 }
  0x1a   :  { %p453_p10 = scmp.ne.s32.totalorder %s43_s28, %s452_s7  ;;  %p458_p12 = scmp.lt.s32.totalorder %s452_s7, %s452_s7 }
  0x1c   :  { %p459_p13 = por %p458_p12, %p457_p11 }
  0x1e   :  { %p460_p0 = pnand %p459_p13, %p453_p10 }
  0x20   :  { %463 = shalt.err (!%p460_p0)
}
  0x21   :  { %48 = dma.hbm_to_vmem [thread:$0]  %s549_s3, 1024, %s43_s28, [#allocation7], %s491_s21, %s491_s21, %s492_s22  }
  0x22   :  { %484 = dma.done.wait [#allocation4], 64  }
  0x23   :  { %485 = vsyncadd [#allocation4], 4294967232 }
  0x24   :  { %486 = dma.done.wait [#allocation7], 2048  }
  0x25   :  { %487 = vsyncadd [#allocation7], 4294965248  ;;  %v495_v0 = vmov 0.0   ;;  %vm496_vm0 = vmmov 0   ;;  %v388_v1 = vld [vmem:[#allocation6 + $0x38] sm:$0xff]   ;;  %v389_v2 = vld [vmem:[#allocation6 + $0x30] sm:$0xff]  }
  0x26   :  { %340 = vmatprep.subr.bf16.mxu0 %v495_v0  ;;  %356 = vmatprep.mubr.msk.bf16.mxu0 %vm496_vm0, %v495_v0  ;;  %v390_v3 = vld [vmem:[#allocation6 + $0x28] sm:$0xff]   ;;  %v396_v4 = vld [vmem:[#allocation8 + $0x38] sm:$0xff]   ;;  %v391_v5 = vld [vmem:[#allocation6 + $0x20] sm:$0xff]   ;;  %s497_s11 = smov [#allocation9]  }
  0x27   :  { %360 = vmatprep.subr.bf16.mxu1 %v495_v0  ;;  %376 = vmatprep.mubr.msk.bf16.mxu1 %vm496_vm0, %v495_v0  ;;  %v397_v6 = vld [vmem:[#allocation8 + $0x30] sm:$0xff]   ;;  %v392_v7 = vld [vmem:[#allocation6 + $0x18] sm:$0xff]   ;;  %v398_v8 = vld [vmem:[#allocation8 + $0x28] sm:$0xff]   ;;  %s294_s12 = sshll.u32 %s497_s11, 4  ;;  %s295_s12 = int_to_ptr.vmem [resolvable:$true] %s294_s12 }
  0x28   :  { %341 = vmatpush3.bf16.msra.mxu0 %v388_v1  ;;  %361 = vmatpush3.bf16.msra.mxu1 %v396_v4  ;;  %v393_v9 = vld [vmem:[#allocation6 + $0x10] sm:$0xff]   ;;  %v399_v10 = vld [vmem:[#allocation8 + $0x20] sm:$0xff]   ;;  %v394_v11 = vld [vmem:[#allocation6 + $0x8] sm:$0xff]   ;;  %p469_p2 = scmp.lt.s32.totalorder %s295_s12, %s295_s12 }
  0x29   :  { %342 = vmatprep.subr.bf16.mxu0 %v495_v0  ;;  %362 = vmatprep.subr.bf16.mxu1 %v495_v0  ;;  %v400_v12 = vld [vmem:[#allocation8 + $0x18] sm:$0xff]   ;;  %v395_v13 = vld [vmem:[#allocation6] sm:$0xff]   ;;  %v401_v15 = vld [vmem:[#allocation8 + $0x10] sm:$0xff]  }
  0x2a   :  { %v61_v14 = vld [vmem:[#allocation3] sm:$0xf]  ;;  %v402_v16 = vld [vmem:[#allocation8 + $0x8] sm:$0xff]   ;;  %v403_v17 = vld [vmem:[#allocation8] sm:$0xff]  }
  0x2b   :  { %v304_v18 = vld [vmem:[%s548_s2] ss:$0 sm:$0xff]  ;;  %s464_s2 = scalar_lea.vmem %s295_s12, 128 }
  0x2c   :  { %343 = vmatpush3.bf16.msra.mxu0 %v389_v2  ;;  %363 = vmatpush3.bf16.msra.mxu1 %v397_v6  ;;  %v313_v26 = vld [vmem:[%s550_s4] ss:$0 sm:$0xff]  ;;  %p465_p1 = scmp.ne.s32.totalorder %s295_s12, %s464_s2  ;;  %p470_p3 = scmp.lt.s32.totalorder %s464_s2, %s464_s2 }
  0x2d   :  { %344 = vmatprep.subr.bf16.mxu0 %v495_v0  ;;  %364 = vmatprep.subr.bf16.mxu1 %v495_v0 }
  0x2e   :  { %p471_p4 = por %p470_p3, %p469_p2 }
  0x30   :  { %345 = vmatpush3.bf16.msra.mxu0 %v390_v3  ;;  %365 = vmatpush3.bf16.msra.mxu1 %v398_v8  ;;  %p472_p5 = pnand %p471_p4, %p465_p1 }
  0x31   :  { %346 = vmatprep.subr.bf16.mxu0 %v495_v0  ;;  %366 = vmatprep.subr.bf16.mxu1 %v495_v0 }
  0x34   :  { %347 = vmatpush3.bf16.msra.mxu0 %v391_v5  ;;  %367 = vmatpush3.bf16.msra.mxu1 %v399_v10 }
  0x35   :  { %348 = vmatprep.subr.bf16.mxu0 %v495_v0  ;;  %368 = vmatprep.subr.bf16.mxu1 %v495_v0 }
  0x38   :  { %349 = vmatpush3.bf16.msra.mxu0 %v392_v7  ;;  %369 = vmatpush3.bf16.msra.mxu1 %v400_v12 }
  0x39   :  { %350 = vmatprep.subr.bf16.mxu0 %v495_v0  ;;  %370 = vmatprep.subr.bf16.mxu1 %v495_v0 }
  0x3c   :  { %351 = vmatpush3.bf16.msra.mxu0 %v393_v9  ;;  %371 = vmatpush3.bf16.msra.mxu1 %v401_v15 }
  0x3d   :  { %352 = vmatprep.subr.bf16.mxu0 %v495_v0  ;;  %372 = vmatprep.subr.bf16.mxu1 %v495_v0 }
  0x40   :  { %353 = vmatpush3.bf16.msra.mxu0 %v394_v11  ;;  %373 = vmatpush3.bf16.msra.mxu1 %v402_v16 }
  0x41   :  { %354 = vmatprep.subr.bf16.mxu0 %v495_v0  ;;  %374 = vmatprep.subr.bf16.mxu1 %v495_v0 }
  0x44   :  { %355 = vmatpush3.bf16.msra.mxu0 %v395_v13  ;;  %375 = vmatpush3.bf16.msra.mxu1 %v403_v17 }
  0x47   :  { %357 = vmatmul.mubr.bf16.vlgmr.msra.gmra.mxu0 %v61_v14 }
 0x107   :  { %v167_v19 = vpop.f32.mrf.mxu0 }
 0x108   :  { %v168_v20 = vadd.f32 %v304_v18, %v167_v19 }
 0x109   :  { %v358_v21 = vpop.f32.mrf.mxu0 }
 0x10a   :  { %v173_v22 = vpack.c.bf16 %v168_v20, %v168_v20 }
 0x10b   :  { %v170_v23 = vpop.f32.mrf.mxu0 }
 0x10c   :  { %174 = vst [vmem:[#allocation2] sm:$0xf] %v173_v22 }
 0x10d   :  { %v359_v24 = vpop.f32.mrf.mxu0 }
 0x113   :  { %v175_v25 = vld [vmem:[#allocation2] sm:$0xf] }
 0x114   :  { %377 = vmatmul.mubr.bf16.vlgmr.msra.gmra.mxu1 %v175_v25 }
 0x1d4   :  { %v281_v27 = vpop.f32.mrf.mxu1 }
 0x1d5   :  { %v282_v28 = vadd.f32 %v313_v26, %v281_v27 }
 0x1d6   :  { %v378_v29 = vpop.f32.mrf.mxu1 }
 0x1d7   :  { %287 = vst [vmem:[#allocation9] sm:$0xff] %v282_v28 }
 0x1d8   :  { %v284_v30 = vpop.f32.mrf.mxu1 }
 0x1d9   :  { %475 = shalt.err (!%p472_p5)
}
 0x1da   :  { %297 = dma.vmem_to_hbm [thread:$0]  %s295_s12, 128, %s551_s5, [#allocation5]   ;;  %v379_v31 = vpop.f32.mrf.mxu1 }
 0x1db   :  { %488 = dma.done.wait [#allocation5], 128  }
 0x1dc   :  { %489 = vsyncadd [#allocation5], 4294967168 }
 0x1dd   :  { %301 = vsyncpa [#allocation4], 1 }
 0x1de   :  { %302 = vsyncpa [#allocation7], 1 }
 0x1df   :  { %303 = vsyncpa [#allocation5], 1 }

</bundles_post_ra>
